<compile_context>
chip_gen: v5e
topology: v5e:2x2
jax: 0.10.0
libtpu: 0.0.40
codegen_flags: <defaults>
</compile_context>

<pallas_src>
import functools

import jax
import jax.numpy as jnp
import numpy as np
from jax.experimental import pallas as pl
from jax.experimental.pallas import tpu as pltpu

_LANE = 128
_DEFAULT_VMEM_BUDGET = 24 * 1024 * 1024   # per-step block budget (dbl-buffered in+out)


# ---------------------------------------------------------------------------
# One-time parameter packing (PyTorch layouts: Conv2d weight OIHW, bias (O,)).
# ---------------------------------------------------------------------------
def pack_params(p):
    """Collapse each dilated 3x3 conv to its centre tap and pre-pack.

    Exact because every conv sees a 1x1 (pooled) input with zero padding and
    padding == dilation, so only w[:, :, 1, 1] ever touches non-zero data.
    Call ONCE at parameter-load time (not per forward) so no slice/transpose/
    concat XLA ops are dispatched on the hot path.
    """
    cfg = {"w1": (3, 1, 3, 3), "w2": (3, 1, 5, 5),      # (kernel, stride, pad, dil)
           "w3": (3, 1, 7, 7), "w4": (3, 1, 1, 1)}
    for name, (k, s, pad, dil) in cfg.items():
        assert p[name].shape[-2:] == (k, k) and s == 1 and pad == dil, (
            "centre-tap collapse requires 3x3, stride 1, padding == dilation")
    w1t = jnp.concatenate([p["w1"][:, :, 1, 1].T,
                           p["w2"][:, :, 1, 1].T,
                           p["w3"][:, :, 1, 1].T], axis=1)              # (C, 3*mid)
    b1 = jnp.concatenate([p["b1"], p["b2"], p["b3"]], axis=0)[None, :]  # (1, 3*mid)
    w4 = p["w4"][:, :, 1, 1]                                            # (C, 3*mid)
    b4 = p["b4"][:, None]                                               # (C, 1)
    return {"w1t": w1t, "b1": b1, "w4": w4, "b4": b4}


# ---------------------------------------------------------------------------
# Kernels
# ---------------------------------------------------------------------------
def _attention(pooled, w1t, b1, w4, b4):
    """pooled (..., C, 1) -> per-channel gate (..., C, 1).  VPU + XLU only."""
    # c1/c2/c3 centre taps + ReLU: broadcast-mul, sublane (channel) reduction.
    h = jnp.sum(w1t * pooled, axis=-2, keepdims=True) + b1      # (..., 1, 3*mid)
    h = jnp.maximum(h, 0.0)
    # c4 centre tap + Sigmoid: broadcast-mul, lane reduction; exp/recip on EUP.
    z = jnp.sum(w4 * h, axis=-1, keepdims=True) + b4            # (..., C, 1)
    return jax.nn.sigmoid(z)


def _ca_fused_kernel(x_ref, w1t_ref, b1_ref, w4_ref, b4_ref, o_ref, *, inv_hw):
    # x_ref/o_ref: (NB, C, HWp) with H*W on the 128-lane axis.
    x = x_ref[...]
    # AdaptiveAvgPool2d(1): lane reduction, accumulate in f32; divide by the
    # TRUE H*W so zero lane-padding does not perturb the mean.
    pooled = jnp.sum(x.astype(jnp.float32), axis=-1, keepdims=True) * inv_hw
    s = _attention(pooled, w1t_ref[...], b1_ref[...], w4_ref[...], b4_ref[...])
    o_ref[...] = (x * s.astype(x.dtype)).astype(o_ref.dtype)


def _ca_pool_kernel(x_ref, w1t_ref, b1_ref, w4_ref, b4_ref, s_ref, acc_ref, *,
                    inv_hw):
    # Pass 1 of the HW-tiled path: x block (1, C, hw_tile); acc (C, 1) scratch.
    t = pl.program_id(1)

    @pl.when(t == 0)
    def _():
        acc_ref[...] = jnp.zeros_like(acc_ref)

    acc_ref[...] += jnp.sum(x_ref[0].astype(jnp.float32), axis=-1, keepdims=True)

    @pl.when(t == pl.num_programs(1) - 1)
    def _():
        pooled = acc_ref[...] * inv_hw                                   # (C, 1)
        s_ref[0] = _attention(pooled, w1t_ref[...], b1_ref[...],
                              w4_ref[...], b4_ref[...]).astype(s_ref.dtype)


def _ca_scale_kernel(x_ref, s_ref, o_ref):
    # Pass 2 of the HW-tiled path: o = x * s, lane-dense stream.
    x = x_ref[...]
    o_ref[...] = (x * s_ref[...].astype(x.dtype)).astype(o_ref.dtype)


# ---------------------------------------------------------------------------
# Forward wrapper
# ---------------------------------------------------------------------------
def _ceil_to(v, m):
    return ((v + m - 1) // m) * m


@functools.partial(jax.jit, static_argnames=("vmem_budget_bytes",))
def calayer_forward(x_nchw, packed, *, vmem_budget_bytes=_DEFAULT_VMEM_BUDGET):
    """CALayer forward.  x_nchw: (N, C, H, W), float32 or bfloat16."""
    N, C, H, W = x_nchw.shape
    HW = H * W
    w1t, b1, w4, b4 = packed["w1t"], packed["b1"], packed["w4"], packed["b4"]
    three_mid = w1t.shape[1]
    elem = x_nchw.dtype.itemsize
    inv_hw = 1.0 / HW

    # Lane-dense guard: zero-pad flattened spatial axis to a multiple of 128 so
    # the big x*s store is unmasked (exact: mean divides by the true HW).
    HWp = _ceil_to(HW, _LANE)
    x_flat = x_nchw.reshape(N, C, HW)
    if HWp != HW:
        x_flat = jnp.pad(x_flat, ((0, 0), (0, 0), (0, HWp - HW)))

    weight_bytes = sum(int(np.prod(a.shape)) * a.dtype.itemsize
                       for a in (w1t, b1, w4, b4))
    cost = pl.CostEstimate(
        flops=int(3 * N * C * HW + 4 * N * C * three_mid),
        transcendentals=int(N * C),
        bytes_accessed=int(2 * N * C * HWp * elem + weight_bytes))

    weight_specs = [
        pl.BlockSpec((C, three_mid), lambda *_: (0, 0)),
        pl.BlockSpec((1, three_mid), lambda *_: (0, 0)),
        pl.BlockSpec((C, three_mid), lambda *_: (0, 0)),
        pl.BlockSpec((C, 1), lambda *_: (0, 0)),
    ]

    img_bytes = C * HWp * elem            # one image's block (input or output)
    per_img_vmem = 2 * 2 * img_bytes      # double-buffered input + output

    if per_img_vmem <= vmem_budget_bytes:
        # ---- Single-pass fused kernel: x read from HBM once, written once. --
        nb_cap = max(1, vmem_budget_bytes // per_img_vmem)
        # Keep >= 2 "parallel" steps when N >= 2 so both v7x TensorCores get
        # work; otherwise make the blocks as large as the VMEM budget allows
        # (amortizes the ~0.35 us per-step overhead on single-TC v5e/v6e).
        n_steps = max(min(N, 2), pl.cdiv(N, nb_cap))
        nb = pl.cdiv(N, n_steps)
        out = pl.pallas_call(
            functools.partial(_ca_fused_kernel, inv_hw=inv_hw),
            out_shape=jax.ShapeDtypeStruct((N, C, HWp), x_nchw.dtype),
            grid=(n_steps,),
            in_specs=[pl.BlockSpec((nb, C, HWp), lambda n: (n, 0, 0))]
                     + weight_specs,
            out_specs=pl.BlockSpec((nb, C, HWp), lambda n: (n, 0, 0)),
            compiler_params=pltpu.CompilerParams(
                dimension_semantics=("parallel",),
                vmem_limit_bytes=int(max(32 << 20, nb * per_img_vmem + (4 << 20)))),
            cost_estimate=cost,
        )(x_flat, w1t, b1, w4, b4)
    else:
        # ---- Two-pass HW-tiled fallback for images too large for VMEM. ------
        # Pass 1 streams x once to pool and compute the per-channel gate s;
        # pass 2 streams x again for the x*s rescale.  1.5x the HBM traffic of
        # the fused path, but never exceeds the VMEM budget (v7x: 64 MiB).
        hw_tile = max(_LANE,
                      (vmem_budget_bytes // (4 * C * elem)) // _LANE * _LANE)
        hw_tile = min(hw_tile, HWp)
        HWt = _ceil_to(HWp, hw_tile)
        if HWt != HWp:
            x_flat = jnp.pad(x_flat, ((0, 0), (0, 0), (0, HWt - HWp)))
        n_tiles = HWt // hw_tile
        vmem_limit = int(max(32 << 20, 4 * C * hw_tile * elem + (4 << 20)))

        s = pl.pallas_call(
            functools.partial(_ca_pool_kernel, inv_hw=inv_hw),
            out_shape=jax.ShapeDtypeStruct((N, C, 1), jnp.float32),
            grid=(N, n_tiles),
            in_specs=[pl.BlockSpec((1, C, hw_tile), lambda n, t: (n, 0, t))]
                     + weight_specs,
            out_specs=pl.BlockSpec((1, C, 1), lambda n, t: (n, 0, 0)),
            scratch_shapes=[pltpu.VMEM((C, 1), jnp.float32)],
            compiler_params=pltpu.CompilerParams(
                dimension_semantics=("parallel", "arbitrary"),
                vmem_limit_bytes=vmem_limit),
            cost_estimate=cost,
        )(x_flat, w1t, b1, w4, b4)

        out = pl.pallas_call(
            _ca_scale_kernel,
            out_shape=jax.ShapeDtypeStruct((N, C, HWt), x_nchw.dtype),
            grid=(N, n_tiles),
            in_specs=[pl.BlockSpec((1, C, hw_tile), lambda n, t: (n, 0, t)),
                      pl.BlockSpec((1, C, 1), lambda n, t: (n, 0, 0))],
            out_specs=pl.BlockSpec((1, C, hw_tile), lambda n, t: (n, 0, t)),
            compiler_params=pltpu.CompilerParams(
                dimension_semantics=("parallel", "parallel"),
                vmem_limit_bytes=vmem_limit),
            cost_estimate=cost,
        )(x_flat, s)

    if out.shape[-1] != HW:
        out = out[:, :, :HW]
    return out.reshape(N, C, H, W)


# ---------------------------------------------------------------------------
# Parameters (PyTorch layouts: Conv2d weight OIHW, bias (O,))
# ---------------------------------------------------------------------------
def make_params(key, channel, reduction=16):
    mid = channel // reduction
    ks = jax.random.split(key, 8)

    def w(k, shape):
        return jax.random.normal(k, shape, jnp.float32) * 0.1

    return {
        "w1": w(ks[0], (mid, channel, 3, 3)), "b1": w(ks[1], (mid,)),
        "w2": w(ks[2], (mid, channel, 3, 3)), "b2": w(ks[3], (mid,)),
        "w3": w(ks[4], (mid, channel, 3, 3)), "b3": w(ks[5], (mid,)),
        "w4": w(ks[6], (channel, 3 * mid, 3, 3)), "b4": w(ks[7], (channel,)),
    }


# ---------------------------------------------------------------------------
# Pure-JAX reference: the FULL dilated convolutions, exactly as PyTorch does.
# ---------------------------------------------------------------------------
def ref_forward(x_nchw, p):
    dn = ("NCHW", "OIHW", "NCHW")

    def conv(inp, w, b, pad, dil):
        out = jax.lax.conv_general_dilated(
            inp, w, window_strides=(1, 1),
            padding=((pad, pad), (pad, pad)),
            rhs_dilation=(dil, dil), dimension_numbers=dn)
        return out + b.reshape(1, -1, 1, 1)

    y = jnp.mean(x_nchw, axis=(2, 3), keepdims=True)        # AdaptiveAvgPool2d(1)
    c1 = jax.nn.relu(conv(y, p["w1"], p["b1"], 3, 3))       # BasicBlock(k3,s1,p3,d3)
    c2 = jax.nn.relu(conv(y, p["w2"], p["b2"], 5, 5))       # BasicBlock(k3,s1,p5,d5)
    c3 = jax.nn.relu(conv(y, p["w3"], p["b3"], 7, 7))       # BasicBlock(k3,s1,p7,d7)
    cc = jnp.concatenate([c1, c2, c3], axis=1)
    s = jax.nn.sigmoid(conv(cc, p["w4"], p["b4"], 1, 1))    # BasicBlockSig(k3,s1,p1)
    return x_nchw * s


if __name__ == "__main__":
    C, reduction = 64, 16                 # mid channels = 4
    key = jax.random.PRNGKey(0)
    kx, kp = jax.random.split(key)
    params = make_params(kp, C, reduction)
    packed = pack_params(params)          # one-time repacking, not per forward

    def check(name, x, tol, **kw):
        out = jax.block_until_ready(calayer_forward(x, packed, **kw))
        ref = ref_forward(x.astype(jnp.float32), params)
        assert out.shape == x.shape and out.dtype == x.dtype, name
        np.testing.assert_allclose(np.asarray(out, np.float32), np.asarray(ref),
                                   rtol=tol, atol=tol, err_msg=name)

    x = jax.random.normal(kx, (2, C, 16, 16), jnp.float32)
    check("fused_f32", x, 1e-4)                                  # default path
    x3 = jax.random.normal(kx, (3, C, 16, 16), jnp.float32)
    check("fused_f32_odd_batch", x3, 1e-4)                       # partial batch block
    x_odd = jax.random.normal(kx, (2, C, 10, 10), jnp.float32)
    check("fused_f32_lane_pad", x_odd, 1e-4)                     # HW not mult of 128
    check("two_pass_tiled", x, 1e-4, vmem_budget_bytes=128 * 1024)  # forced fallback
    check("fused_bf16", x.astype(jnp.bfloat16), 2e-2)            # bf16 I/O variant

    print("KERNEL_OK")
</pallas_src>

<mosaic_0001>
module attributes {stable_mosaic.version = 11 : i64} {
  func.func @_ca_fused_kernel(%arg0: i32, %arg1: memref<1x64x256xf32, #tpu.memory_space<vmem>>, %arg2: memref<64x12xf32, #tpu.memory_space<vmem>>, %arg3: memref<1x12xf32, #tpu.memory_space<vmem>>, %arg4: memref<64x12xf32, #tpu.memory_space<vmem>>, %arg5: memref<64x1xf32, #tpu.memory_space<vmem>>, %arg6: memref<1x64x256xf32, #tpu.memory_space<vmem>>) attributes {dimension_semantics = [#tpu.dimension_semantics<parallel>], iteration_bounds = array<i64: 2>, scalar_prefetch = 0 : i64, scratch_operands = 0 : i64, tpu.core_type = #tpu.core_type<tc>, window_params = [{transform_indices = @transform_0, window_bounds = array<i64: 1, 64, 256>}, {pipeline_mode = #tpu.pipeline_mode<synchronous>, transform_indices = @transform_1, window_bounds = array<i64: 64, 12>}, {pipeline_mode = #tpu.pipeline_mode<synchronous>, transform_indices = @transform_2, window_bounds = array<i64: 1, 12>}, {pipeline_mode = #tpu.pipeline_mode<synchronous>, transform_indices = @transform_3, window_bounds = array<i64: 64, 12>}, {pipeline_mode = #tpu.pipeline_mode<synchronous>, transform_indices = @transform_4, window_bounds = array<i64: 64, 1>}, {transform_indices = @transform_5, window_bounds = array<i64: 1, 64, 256>}]} {
    %c0 = arith.constant 0 : index
    %c0_0 = arith.constant 0 : index
    %c0_1 = arith.constant 0 : index
    %0 = vector.load %arg1[%c0, %c0_0, %c0_1] : memref<1x64x256xf32, #tpu.memory_space<vmem>>, vector<1x64x256xf32>
    %cst = arith.constant dense<0.000000e+00> : vector<1x64xf32>
    %1 = vector.multi_reduction <add>, %0, %cst [2] : vector<1x64x256xf32> to vector<1x64xf32>
    %2 = vector.shape_cast %1 : vector<1x64xf32> to vector<1x64x1xf32>
    %cst_2 = arith.constant 3.906250e-03 : f32
    %3 = vector.broadcast %cst_2 : f32 to vector<1x64x1xf32>
    %4 = arith.mulf %2, %3 : vector<1x64x1xf32>
    %c0_3 = arith.constant 0 : index
    %c0_4 = arith.constant 0 : index
    %5 = vector.load %arg2[%c0_3, %c0_4] : memref<64x12xf32, #tpu.memory_space<vmem>>, vector<64x12xf32>
    %c0_5 = arith.constant 0 : index
    %c0_6 = arith.constant 0 : index
    %6 = vector.load %arg3[%c0_5, %c0_6] : memref<1x12xf32, #tpu.memory_space<vmem>>, vector<1x12xf32>
    %c0_7 = arith.constant 0 : index
    %c0_8 = arith.constant 0 : index
    %7 = vector.load %arg4[%c0_7, %c0_8] : memref<64x12xf32, #tpu.memory_space<vmem>>, vector<64x12xf32>
    %c0_9 = arith.constant 0 : index
    %c0_10 = arith.constant 0 : index
    %8 = vector.load %arg5[%c0_9, %c0_10] : memref<64x1xf32, #tpu.memory_space<vmem>>, vector<64x1xf32>
    %9 = vector.shape_cast %5 : vector<64x12xf32> to vector<1x64x12xf32>
    %10 = vector.broadcast %4 : vector<1x64x1xf32> to vector<1x64x12xf32>
    %11 = arith.mulf %9, %10 : vector<1x64x12xf32>
    %cst_11 = arith.constant dense<0.000000e+00> : vector<1x12xf32>
    %12 = vector.multi_reduction <add>, %11, %cst_11 [1] : vector<1x64x12xf32> to vector<1x12xf32>
    %13 = vector.shape_cast %12 : vector<1x12xf32> to vector<1x1x12xf32>
    %14 = vector.shape_cast %6 : vector<1x12xf32> to vector<1x1x12xf32>
    %15 = arith.addf %13, %14 : vector<1x1x12xf32>
    %cst_12 = arith.constant 0.000000e+00 : f32
    %16 = vector.broadcast %cst_12 : f32 to vector<1x1x12xf32>
    %17 = arith.maximumf %15, %16 : vector<1x1x12xf32>
    %18 = vector.shape_cast %7 : vector<64x12xf32> to vector<1x64x12xf32>
    %19 = vector.broadcast %17 : vector<1x1x12xf32> to vector<1x64x12xf32>
    %20 = arith.mulf %18, %19 : vector<1x64x12xf32>
    %cst_13 = arith.constant dense<0.000000e+00> : vector<1x64xf32>
    %21 = vector.multi_reduction <add>, %20, %cst_13 [2] : vector<1x64x12xf32> to vector<1x64xf32>
    %22 = vector.shape_cast %21 : vector<1x64xf32> to vector<1x64x1xf32>
    %23 = vector.shape_cast %8 : vector<64x1xf32> to vector<1x64x1xf32>
    %24 = arith.addf %22, %23 : vector<1x64x1xf32>
    %25 = arith.negf %24 : vector<1x64x1xf32>
    %26 = math.exp %25 : vector<1x64x1xf32>
    %cst_14 = arith.constant 1.000000e+00 : f32
    %27 = vector.broadcast %cst_14 : f32 to vector<1x64x1xf32>
    %28 = arith.addf %27, %26 : vector<1x64x1xf32>
    %29 = arith.divf %27, %28 : vector<1x64x1xf32>
    %30 = vector.broadcast %29 : vector<1x64x1xf32> to vector<1x64x256xf32>
    %31 = arith.mulf %0, %30 : vector<1x64x256xf32>
    %c0_15 = arith.constant 0 : index
    %c0_16 = arith.constant 0 : index
    %c0_17 = arith.constant 0 : index
    %32 = vector.load %arg6[%c0_15, %c0_16, %c0_17] : memref<1x64x256xf32, #tpu.memory_space<vmem>>, vector<1x64x256xf32>
    tpu.vector_store %arg6[%c0_15, %c0_16, %c0_17], %31 {strides = array<i32>} : memref<1x64x256xf32, #tpu.memory_space<vmem>>, vector<1x64x256xf32>,
    return
  }
  func.func @transform_0(%arg0: i32) -> (i32, i32, i32) {
    %c0_i32 = arith.constant 0 : i32
    %c0_i32_0 = arith.constant 0 : i32
    %c0_i32_1 = arith.constant 0 : i32
    return %arg0, %c0_i32, %c0_i32_0 : i32, i32, i32
  }
  func.func @transform_1(%arg0: i32) -> (i32, i32) {
    %c0_i32 = arith.constant 0 : i32
    %c0_i32_0 = arith.constant 0 : i32
    %c0_i32_1 = arith.constant 0 : i32
    return %c0_i32, %c0_i32_0 : i32, i32
  }
  func.func @transform_2(%arg0: i32) -> (i32, i32) {
    %c0_i32 = arith.constant 0 : i32
    %c0_i32_0 = arith.constant 0 : i32
    %c0_i32_1 = arith.constant 0 : i32
    return %c0_i32, %c0_i32_0 : i32, i32
  }
  func.func @transform_3(%arg0: i32) -> (i32, i32) {
    %c0_i32 = arith.constant 0 : i32
    %c0_i32_0 = arith.constant 0 : i32
    %c0_i32_1 = arith.constant 0 : i32
    return %c0_i32, %c0_i32_0 : i32, i32
  }
  func.func @transform_4(%arg0: i32) -> (i32, i32) {
    %c0_i32 = arith.constant 0 : i32
    %c0_i32_0 = arith.constant 0 : i32
    %c0_i32_1 = arith.constant 0 : i32
    return %c0_i32, %c0_i32_0 : i32, i32
  }
  func.func @transform_5(%arg0: i32) -> (i32, i32, i32) {
    %c0_i32 = arith.constant 0 : i32
    %c0_i32_0 = arith.constant 0 : i32
    %c0_i32_1 = arith.constant 0 : i32
    return %arg0, %c0_i32, %c0_i32_0 : i32, i32, i32
  }
}

</mosaic_0001>

<bundles_post_ra>
// kernel: calayer_forward.1
= control target key start
LH: loop header
LB: loop body
LE: loop exit
PB: predicated region body
PF: predicated region fallthrough
CT: control target
= control target key end

     0   :  { %s754_s18 = smov 0   ;;  %s1025_s0 = inlined_call_operand.vmem [shape: f32[2,64,256], index: 0, kind: input, shape index: {}]   ;;  %s1026_s1 = inlined_call_operand.vmem [shape: f32[64,12], index: 1, kind: input, shape index: {}]   ;;  %s1027_s2 = inlined_call_operand.vmem [shape: f32[1,12], index: 2, kind: input, shape index: {}]   ;;  %s1028_s3 = inlined_call_operand.vmem [shape: f32[64,12], index: 3, kind: input, shape index: {}]   ;;  %s1029_s4 = inlined_call_operand.vmem [shape: f32[64,1], index: 4, kind: input, shape index: {}]   ;;  %s1030_s5 = inlined_call_operand.vmem [shape: f32[2,64,256], index: 5, kind: output, shape index: {}]  }
   0x1 LB: > { %s650_s19 = sadd.s32 4294967295, %s721_s18   ;;  %p654_p0 = scmp.ge.s32.totalorder %s721_s18, 1  ;;  %s721_s18 = sphi %s754_s18, %s15_s18  }
   0x2   : > { %p187_p1 = scmp.lt.s32.totalorder %s721_s18, 3 }
   0x4   : > { %p188_p2 = pnand %p654_p0, %p187_p1 }
   0x5   : > { %p215_p3 = scmp.lt.s32.totalorder (!%p188_p2), %s650_s19, 1 }
   0x6   : > { %191 = sbr.rel (%p188_p2) target bundleno = 466 (0x1d2), region = 40 }
   0xb   : > { %s1034_s19 = smov (!%p215_p3, %s650_s19), 1  ;;  %v273_v28 = vld [vmem:[%s1026_s1] sm:$0xff]  ;;  %v275_v30 = vld [vmem:[%s1026_s1 + $0x10] sm:$0xff]  ;;  %v274_v31 = vld [vmem:[%s1026_s1 + $0x8] sm:$0xff]  ;;  %vm306_vm0 = vcmask 97280  }
   0xc   : > { %s669_s20 = sshll.u32 %s1034_s19, 7  ;;  %v276_v35 = vld [vmem:[%s1026_s1 + $0x18] sm:$0xff]  ;;  %v277_v43 = vld [vmem:[%s1026_s1 + $0x20] sm:$0xff]  ;;  %v278_v45 = vld [vmem:[%s1026_s1 + $0x28] sm:$0xff] }
   0xd   : > { %s219_s23 = scalar_lea.vmem %s1025_s0, %s669_s20  ;;  %v279_v54 = vld [vmem:[%s1026_s1 + $0x30] sm:$0xff]  ;;  %v280_v57 = vld [vmem:[%s1026_s1 + $0x38] sm:$0xff]  ;;  %s988_s7 = scalar_lea.vmem %s1030_s5, %s669_s20 }
   0xe   : > { %v770_v0 = vld [vmem:[%s219_s23] sm:$0xff]  ;;  %v772_v1 = vld [vmem:[%s219_s23 + $0x8] sm:$0xff]  ;;  %v788_v9 = vld [vmem:[%s219_s23 + $0x10] sm:$0xff] }
   0xf   : > { %v774_v2 = vld [vmem:[%s219_s23 + $0x20] sm:$0xff]  ;;  %v241_v3 = vadd.f32 %v772_v1, %v770_v0  ;;  %v778_v4 = vld [vmem:[%s219_s23 + $0x28] sm:$0xff]  ;;  %v790_v10 = vld [vmem:[%s219_s23 + $0x18] sm:$0xff] }
  0x10   : > { %v780_v5 = vld [vmem:[%s219_s23 + $0x40] sm:$0xff]  ;;  %v782_v6 = vld [vmem:[%s219_s23 + $0x48] sm:$0xff]  ;;  %v247_v7 = vadd.f32 %v778_v4, %v774_v2  ;;  %v792_v11 = vld [vmem:[%s219_s23 + $0x30] sm:$0xff]  ;;  %v244_v15 = vadd.f32 %v790_v10, %v788_v9 }
  0x11   : > { %v253_v8 = vadd.f32 %v782_v6, %v780_v5  ;;  %242 = vadd.xlane.f32.xlu0 %v241_v3  ;;  %v794_v12 = vld [vmem:[%s219_s23 + $0x38] sm:$0xff]  ;;  %v796_v13 = vld [vmem:[%s219_s23 + $0x50] sm:$0xff]  ;;  %v806_v18 = vld [vmem:[%s219_s23 + $0x60] sm:$0xff] }
  0x12   : > { %248 = vadd.xlane.f32.xlu1 %v247_v7  ;;  %v798_v14 = vld [vmem:[%s219_s23 + $0x58] sm:$0xff]  ;;  %v250_v16 = vadd.f32 %v794_v12, %v792_v11  ;;  %v808_v19 = vld [vmem:[%s219_s23 + $0x68] sm:$0xff]  ;;  %v810_v20 = vld [vmem:[%s219_s23 + $0x70] sm:$0xff] }
  0x13   : > { %254 = vadd.xlane.f32.xlu2 %v253_v8  ;;  %v256_v17 = vadd.f32 %v798_v14, %v796_v13  ;;  %v812_v21 = vld [vmem:[%s219_s23 + $0x78] sm:$0xff]  ;;  %v259_v22 = vadd.f32 %v808_v19, %v806_v18 }
  0x14   : > { %v262_v23 = vadd.f32 %v812_v21, %v810_v20 }
  0x19   : > { %245 = vadd.xlane.f32.xlu0 %v244_v15 }
  0x1a   : > { %251 = vadd.xlane.f32.xlu1 %v250_v16 }
  0x1b   : > { %257 = vadd.xlane.f32.xlu2 %v256_v17 }
  0x21   : > { %260 = vadd.xlane.f32.xlu0 %v259_v22 }
  0x22   : > { %263 = vadd.xlane.f32.xlu1 %v262_v23 }
  0x84   : > { %v243_v24 = vpop.xlane.xlu0 %242 }
  0x85   : > { %v249_v25 = vpop.xlane.xlu1 %248  ;;  %v265_v27 = vmul.f32 0.00390625, %v243_v24 }
  0x86   : > { %v255_v26 = vpop.xlane.xlu2 %254  ;;  %v267_v29 = vmul.f32 0.00390625, %v249_v25 }
  0x87   : > { %v298_v33 = vmul.f32 %v273_v28, %v265_v27  ;;  %v269_v40 = vmul.f32 0.00390625, %v255_v26  ;;  %v281_v28 = vld [vmem:[%s1027_s2] sm:$0x1] }
  0x88   : > { %v300_v39 = vmul.f32 %v275_v30, %v267_v29 }
  0x89   : > { %v307_v46 = vsel %vm306_vm0, %v298_v33, 0.0  ;;  %v302_v50 = vmul.f32 %v277_v43, %v269_v40  ;;  %v283_v33 = vld [vmem:[%s1028_s3 + $0x8] sm:$0xff]  ;;  %v286_v43 = vld [vmem:[%s1028_s3 + $0x20] sm:$0xff] }
  0x8a   : > { %v310_v49 = vsel %vm306_vm0, %v300_v39, 0.0 }
  0x8b   : > { %v314_v61 = vsel %vm306_vm0, %v302_v50, 0.0 }
  0x8c   : > { %v246_v32 = vpop.xlane.xlu0 %245 }
  0x8d   : > { %v266_v34 = vmul.f32 0.00390625, %v246_v32  ;;  %v252_v36 = vpop.xlane.xlu1 %251  ;;  %v284_v32 = vld [vmem:[%s1028_s3 + $0x10] sm:$0xff] }
  0x8e   : > { %v258_v37 = vpop.xlane.xlu2 %257  ;;  %v268_v38 = vmul.f32 0.00390625, %v252_v36 }
  0x8f   : > { %v299_v41 = vmul.f32 %v274_v31, %v266_v34  ;;  %v270_v42 = vmul.f32 0.00390625, %v258_v37  ;;  %v282_v34 = vld [vmem:[%s1028_s3] sm:$0xff] }
  0x90   : > { %v301_v44 = vmul.f32 %v276_v35, %v268_v38 }
  0x91   : > { %v308_v47 = vsel %vm306_vm0, %v299_v41, 0.0  ;;  %v303_v52 = vmul.f32 %v278_v45, %v270_v42  ;;  %v287_v42 = vld [vmem:[%s1028_s3 + $0x28] sm:$0xff] }
  0x92   : > { %v309_v48 = vadd.f32 %v308_v47, %v307_v46  ;;  %v312_v51 = vsel %vm306_vm0, %v301_v44, 0.0  ;;  %v285_v44 = vld [vmem:[%s1028_s3 + $0x18] sm:$0xff] }
  0x93   : > { %v316_v62 = vsel %vm306_vm0, %v303_v52, 0.0  ;;  %v288_v52 = vld [vmem:[%s1028_s3 + $0x30] sm:$0xff] }
  0x94   : > { %v311_v53 = vadd.f32 %v310_v49, %v309_v48  ;;  %v261_v55 = vpop.xlane.xlu0 %260 }
  0x95   : > { %v271_v56 = vmul.f32 0.00390625, %v261_v55  ;;  %v264_v58 = vpop.xlane.xlu1 %263 }
  0x96   : > { %v313_v59 = vadd.f32 %v312_v51, %v311_v53  ;;  %v272_v60 = vmul.f32 0.00390625, %v264_v58  ;;  %v289_v51 = vld [vmem:[%s1028_s3 + $0x38] sm:$0xff]  ;;  %v291_v58 = vld [vmem:[%s1029_s4 + $0x8] sm:$0xff] }
  0x97   : > { %v304_v63 = vmul.f32 %v279_v54, %v271_v56 }
  0x98   : > { %v315_v3 = vadd.f32 %v314_v61, %v313_v59  ;;  %v305_v7 = vmul.f32 %v280_v57, %v272_v60  ;;  %v292_v57 = vld [vmem:[%s1029_s4 + $0x10] sm:$0xff]  ;;  %v290_v59 = vld [vmem:[%s1029_s4] sm:$0xff] }
  0x99   : > { %v318_v8 = vsel %vm306_vm0, %v304_v63, 0.0 }
  0x9a   : > { %v317_v15 = vadd.f32 %v316_v62, %v315_v3  ;;  %v320_v16 = vsel %vm306_vm0, %v305_v7, 0.0  ;;  %v723_v7 = vmov 0  }
  0x9b   : > { %682 = vset.pattern.permute.xlu0 %v723_v7  ;;  %681 = vset.pattern.permute.xlu2 %v723_v7 }
  0x9c   : > { %v319_v17 = vadd.f32 %v318_v8, %v317_v15  ;;  %680 = vset.pattern.permute.xlu1 %v723_v7 }
  0x9e   : > { %v321_v22 = vadd.f32 %v320_v16, %v319_v17 }
  0xa0   : > { %v322_v23 = vrot.slane %v321_v22, 4 }
  0xa2   : > { %v323_v24 = vadd.f32 %v322_v23, %v321_v22  ;;  %v295_v22 = vld [vmem:[%s1029_s4 + $0x28] sm:$0xff]  ;;  %v294_v23 = vld [vmem:[%s1029_s4 + $0x20] sm:$0xff] }
  0xa4   : > { %v324_v25 = vrot.slane %v323_v24, 2 }
  0xa6   : > { %v325_v26 = vadd.f32 %v324_v25, %v323_v24  ;;  %v293_v24 = vld [vmem:[%s1029_s4 + $0x18] sm:$0xff] }
  0xa8   : > { %v326_v27 = vrot.slane %v325_v26, 1 }
  0xaa   : > { %v327_v29 = vadd.f32 %v326_v27, %v325_v26 }
  0xac   : > { %v328_v30 = vadd.f32 %v327_v29, %v281_v28 }
  0xae   : > { %v329_v31 = vmax.f32 %v328_v30, 0.0 }
  0xb0   : > { %v330_v35 = vperm.slane %v329_v31, 0 }
  0xb2   : > { %v333_v36 = vmul.f32 %v330_v35, %v284_v32  ;;  %v332_v37 = vmul.f32 %v330_v35, %v283_v33  ;;  %v331_v38 = vmul.f32 %v330_v35, %v282_v34  ;;  %v336_v45 = vmul.f32 %v330_v35, %v287_v42 }
  0xb3   : > { %v335_v46 = vmul.f32 %v330_v35, %v286_v43  ;;  %v334_v47 = vmul.f32 %v330_v35, %v285_v44  ;;  %v338_v53 = vmul.f32 %v330_v35, %v289_v51  ;;  %v337_v54 = vmul.f32 %v330_v35, %v288_v52 }
  0xb4   : > { %v345_v39 = vsel %vm306_vm0, %v333_v36, 0.0  ;;  %v342_v40 = vsel %vm306_vm0, %v332_v37, 0.0  ;;  %v339_v41 = vsel %vm306_vm0, %v331_v38, 0.0  ;;  %v354_v48 = vsel %vm306_vm0, %v336_v45, 0.0 }
  0xb5   : > { %346 = vadd.xlane.f32.xlu1 %v345_v39  ;;  %343 = vadd.xlane.f32.xlu0 %v342_v40  ;;  %v351_v49 = vsel %vm306_vm0, %v335_v46, 0.0  ;;  %v348_v50 = vsel %vm306_vm0, %v334_v47, 0.0  ;;  %v360_v55 = vsel %vm306_vm0, %v338_v53, 0.0  ;;  %v357_v56 = vsel %vm306_vm0, %v337_v54, 0.0  ;;  %v297_v40 = vld [vmem:[%s1029_s4 + $0x38] sm:$0xff] }
  0xb6   : > { %340 = vadd.xlane.f32.xlu2 %v339_v41  ;;  %v296_v41 = vld [vmem:[%s1029_s4 + $0x30] sm:$0xff] }
  0xbd   : > { %355 = vadd.xlane.f32.xlu1 %v354_v48  ;;  %352 = vadd.xlane.f32.xlu0 %v351_v49 }
  0xbe   : > { %349 = vadd.xlane.f32.xlu2 %v348_v50 }
  0xc5   : > { %361 = vadd.xlane.f32.xlu0 %v360_v55 }
  0xc6   : > { %358 = vadd.xlane.f32.xlu2 %v357_v56 }
 0x128   : > { %v347_v60 = vpop.xlane.xlu1 %346  ;;  %v344_v61 = vpop.xlane.xlu0 %343 }
 0x129   : > { %v365_v62 = vadd.f32 %v347_v60, %v292_v57  ;;  %v364_v63 = vadd.f32 %v344_v61, %v291_v58  ;;  %v341_v3 = vpop.xlane.xlu2 %340 }
 0x12a   : > { %v363_v8 = vadd.f32 %v341_v3, %v290_v59 }
 0x12b   : > { %v661_v15 = vmul.f32 -1.442695, %v365_v62  ;;  %v660_v16 = vmul.f32 -1.442695, %v364_v63 }
 0x12c   : > { %v659_v17 = vmul.f32 -1.442695, %v363_v8 }
 0x12d   : > { %683 = vpow2.f32 %v661_v15 }
 0x12e   : > { %685 = vpow2.f32 %v660_v16 }
 0x12f   : > { %687 = vpow2.f32 %v659_v17 }
 0x130   : > { %v356_v25 = vpop.xlane.xlu1 %355  ;;  %v353_v26 = vpop.xlane.xlu0 %352 }
 0x131   : > { %v368_v27 = vadd.f32 %v356_v25, %v295_v22  ;;  %v367_v28 = vadd.f32 %v353_v26, %v294_v23  ;;  %v350_v29 = vpop.xlane.xlu2 %349 }
 0x132   : > { %v366_v30 = vadd.f32 %v350_v29, %v293_v24 }
 0x133   : > { %v684_v31 = vpop.eup %683  ;;  %v664_v32 = vmul.f32 -1.442695, %v368_v27  ;;  %v663_v37 = vmul.f32 -1.442695, %v367_v28 }
 0x134   : > { %v686_v33 = vpop.eup %685  ;;  %v397_v34 = vadd.f32 1.0, %v684_v31  ;;  %v662_v39 = vmul.f32 -1.442695, %v366_v30 }
 0x135   : > { %v688_v35 = vpop.eup %687  ;;  %v903_v36 = vadd.f32 1.0, %v686_v33  ;;  %689 = vpow2.f32 %v664_v32 }
 0x136   : > { %691 = vrcp.f32 %v397_v34  ;;  %v905_v38 = vadd.f32 1.0, %v688_v35  ;;  %v442_v48 = vand.u32 2147483647, %v397_v34  ;;  %vm438_vm1 = vweird.f32 %v397_v34 }
 0x137   : > { %693 = vrcp.f32 %v903_v36  ;;  %v444_v54 = vand.u32 2147483648, %v397_v34  ;;  %vm423_vm2 = vweird.f32 %v903_v36  ;;  %v427_v57 = vand.u32 2147483647, %v903_v36 }
 0x138   : > { %695 = vrcp.f32 %v905_v38  ;;  %v362_v42 = vpop.xlane.xlu0 %361  ;;  %vm921_vm3 = vcmp.eq.f32.partialorder %v442_v48, 8.507059e+37  ;;  %v429_v7 = vand.u32 2147483648, %v903_v36  ;;  %v412_v8 = vand.u32 2147483647, %v905_v38 }
 0x139   : > { %697 = vpow2.f32 %v663_v37  ;;  %v370_v43 = vadd.f32 %v362_v42, %v297_v40  ;;  %v359_v44 = vpop.xlane.xlu2 %358  ;;  %v414_v23 = vand.u32 2147483648, %v905_v38  ;;  %v445_v29 = vor.u32 1.1754944e-38, %v444_v54 }
 0x13a   : > { %699 = vpow2.f32 %v662_v39  ;;  %v369_v45 = vadd.f32 %v359_v44, %v296_v41  ;;  %vm408_vm8 = vweird.f32 %v905_v38  ;;  %vm428_vm10 = vcmp.eq.f32.partialorder %v427_v57, 8.507059e+37 }
 0x13b   : > { %v690_v46 = vpop.eup %689  ;;  %v666_v47 = vmul.f32 -1.442695, %v370_v43  ;;  %v430_v33 = vor.u32 1.1754944e-38, %v429_v7  ;;  %v415_v40 = vor.u32 1.1754944e-38, %v414_v23  ;;  %vm413_vm12 = vcmp.eq.f32.partialorder %v412_v8, 8.507059e+37 }
 0x13c   : > { %v692_v49 = vpop.eup %691  ;;  %v915_v50 = vadd.f32 1.0, %v690_v46  ;;  %v665_v51 = vmul.f32 -1.442695, %v369_v45 }
 0x13d   : > { %v694_v52 = vpop.eup %693  ;;  %701 = vpow2.f32 %v666_v47  ;;  %v434_v53 = vmul.f32 %v692_v49, %v397_v34  ;;  %vm439_vm4 = vweird.f32 %v692_v49 }
 0x13e   : > { %v696_v55 = vpop.eup %695  ;;  %703 = vrcp.f32 %v915_v50  ;;  %v419_v56 = vmul.f32 %v694_v52, %v903_v36  ;;  %vm424_vm5 = vweird.f32 %v694_v52  ;;  %vm440_vm7 = vmor %vm438_vm1, %vm439_vm4 }
 0x13f   : > { %v698_v58 = vpop.eup %697  ;;  %705 = vpow2.f32 %v665_v51  ;;  %v435_v59 = vsub.f32 1.0, %v434_v53  ;;  %v404_v61 = vmul.f32 %v696_v55, %v905_v38  ;;  %vm409_vm6 = vweird.f32 %v696_v55  ;;  %vm425_vm9 = vmor %vm423_vm2, %vm424_vm5 }
 0x140   : > { %v700_v62 = vpop.eup %699  ;;  %v926_v63 = vadd.f32 1.0, %v698_v58  ;;  %v420_v3 = vsub.f32 1.0, %v419_v56  ;;  %vm410_vm11 = vmor %vm408_vm8, %vm409_vm6  ;;  %vm483_vm8 = vweird.f32 %v915_v50 }
 0x141   : > { %v930_v15 = vadd.f32 1.0, %v700_v62  ;;  %v436_v16 = vmul.f32 %v692_v49, %v435_v59  ;;  %v405_v17 = vsub.f32 1.0, %v404_v61 }
 0x142   : > { %707 = vrcp.f32 %v926_v63  ;;  %v421_v22 = vmul.f32 %v694_v52, %v420_v3  ;;  %v474_v48 = vand.u32 2147483648, %v926_v63  ;;  %v472_v54 = vand.u32 2147483647, %v926_v63 }
 0x143   : > { %v702_v24 = vpop.eup %701  ;;  %709 = vrcp.f32 %v930_v15  ;;  %v437_v25 = vadd.f32 %v692_v49, %v436_v16  ;;  %v406_v26 = vmul.f32 %v696_v55, %v405_v17  ;;  %v457_v58 = vand.u32 2147483647, %v930_v15 }
 0x144   : > { %v935_v27 = vpop.eup %703  ;;  %v937_v28 = vadd.f32 1.0, %v702_v24  ;;  %v422_v30 = vadd.f32 %v694_v52, %v421_v22  ;;  %vm468_vm15 = vweird.f32 %v926_v63  ;;  %vm453_vm0 = vweird.f32 %v930_v15 }
 0x145   : > { %v706_v31 = vpop.eup %705  ;;  %v441_v32 = vsel %vm440_vm7, %v692_v49, %v437_v25  ;;  %v407_v35 = vadd.f32 %v696_v55, %v406_v26  ;;  %v479_v43 = vmul.f32 %v935_v27, %v915_v50  ;;  %v475_v61 = vor.u32 1.1754944e-38, %v474_v48 }
 0x146   : > { %v944_v37 = vadd.f32 1.0, %v706_v31  ;;  %v446_v39 = vsel %vm921_vm3, %v445_v29, %v441_v32  ;;  %v426_v34 = vsel %vm425_vm9, %v694_v52, %v422_v30  ;;  %711 = vrcp.f32 %v937_v28 }
 0x147   : > { %535 = vperm.xlu0 %682, %v446_v39   ;;  %v431_v38 = vsel %vm428_vm10, %v430_v33, %v426_v34  ;;  %v411_v41 = vsel %vm410_vm11, %v696_v55, %v407_v35  ;;  %v480_v51 = vsub.f32 1.0, %v479_v43  ;;  %v459_v55 = vand.u32 2147483648, %v930_v15 }
 0x148   : > { %v708_v36 = vpop.eup %707  ;;  %713 = vrcp.f32 %v944_v37  ;;  %530 = vperm.xlu2 %681, %v431_v38   ;;  %v416_v42 = vsel %vm413_vm12, %v415_v40, %v411_v41  ;;  %vm473_vm2 = vcmp.eq.f32.partialorder %v472_v54, 8.507059e+37  ;;  %vm458_vm4 = vcmp.eq.f32.partialorder %v457_v58, 8.507059e+37 }
 0x149   : > { %v710_v44 = vpop.eup %709  ;;  %525 = vperm.xlu1 %680, %v416_v42   ;;  %v464_v45 = vmul.f32 %v708_v36, %v926_v63  ;;  %vm469_vm13 = vweird.f32 %v708_v36  ;;  %v481_v3 = vmul.f32 %v935_v27, %v480_v51  ;;  %v460_v16 = vor.u32 1.1754944e-38, %v459_v55 }
 0x14a   : > { %v449_v46 = vmul.f32 %v710_v44, %v930_v15  ;;  %vm454_vm14 = vweird.f32 %v710_v44  ;;  %vm470_vm1 = vmor %vm468_vm15, %vm469_vm13  ;;  %v504_v63 = vand.u32 2147483648, %v944_v37  ;;  %v502_v25 = vand.u32 2147483647, %v944_v37 }
 0x14b   : > { %v465_v47 = vsub.f32 1.0, %v464_v45  ;;  %vm455_vm3 = vmor %vm453_vm0, %vm454_vm14  ;;  %v482_v26 = vadd.f32 %v935_v27, %v481_v3  ;;  %vm484_vm6 = vweird.f32 %v935_v27  ;;  %v489_v30 = vand.u32 2147483648, %v915_v50 }
 0x14c   : > { %v450_v49 = vsub.f32 1.0, %v449_v46  ;;  %v956_v52 = vpop.eup %711  ;;  %vm498_vm7 = vweird.f32 %v944_v37  ;;  %v487_v32 = vand.u32 2147483647, %v915_v50  ;;  %v505_v33 = vor.u32 1.1754944e-38, %v504_v63  ;;  %vm485_vm10 = vmor %vm483_vm8, %vm484_vm6 }
 0x14d   : > { %v466_v53 = vmul.f32 %v708_v36, %v465_v47  ;;  %v509_v7 = vmul.f32 %v956_v52, %v937_v28  ;;  %vm503_vm11 = vcmp.eq.f32.partialorder %v502_v25, 8.507059e+37  ;;  %v486_v39 = vsel %vm485_vm10, %v935_v27, %v482_v26 }
 0x14e   : > { %v714_v56 = vpop.eup %713  ;;  %v451_v57 = vmul.f32 %v710_v44, %v450_v49  ;;  %v490_v38 = vor.u32 1.1754944e-38, %v489_v30  ;;  %vm488_vm12 = vcmp.eq.f32.partialorder %v487_v32, 8.507059e+37  ;;  %vm514_vm13 = vweird.f32 %v956_v52 }
 0x14f   : > { %v467_v59 = vadd.f32 %v708_v36, %v466_v53  ;;  %v494_v60 = vmul.f32 %v714_v56, %v944_v37  ;;  %vm499_vm5 = vweird.f32 %v714_v56  ;;  %v510_v29 = vsub.f32 1.0, %v509_v7 }
 0x150   : > { %v452_v62 = vadd.f32 %v710_v44, %v451_v57  ;;  %vm500_vm9 = vmor %vm498_vm7, %vm499_vm5  ;;  %v491_v41 = vsel %vm488_vm12, %v490_v38, %v486_v39  ;;  %v519_v50 = vand.u32 2147483648, %v937_v28  ;;  %vm513_vm14 = vweird.f32 %v937_v28 }
 0x151   : > { %v471_v8 = vsel %vm470_vm1, %v708_v36, %v467_v59  ;;  %v495_v17 = vsub.f32 1.0, %v494_v60  ;;  %v511_v40 = vmul.f32 %v956_v52, %v510_v29  ;;  %v517_v36 = vand.u32 2147483647, %v937_v28  ;;  %vm515_vm15 = vmor %vm513_vm14, %vm514_vm13 }
 0x152   : > { %v476_v22 = vsel %vm473_vm2, %v475_v61, %v471_v8  ;;  %v456_v23 = vsel %vm455_vm3, %v710_v44, %v452_v62  ;;  %v520_v42 = vor.u32 1.1754944e-38, %v519_v50 }
 0x153   : > { %545 = vperm.xlu1 %680, %v476_v22   ;;  %v461_v15 = vsel %vm458_vm4, %v460_v16, %v456_v23  ;;  %v496_v24 = vmul.f32 %v714_v56, %v495_v17  ;;  %v512_v37 = vadd.f32 %v956_v52, %v511_v40  ;;  %vm518_vm0 = vcmp.eq.f32.partialorder %v517_v36, 8.507059e+37 }
 0x154   : > { %540 = vperm.xlu2 %681, %v461_v15  }
 0x155   : > { %v497_v31 = vadd.f32 %v714_v56, %v496_v24  ;;  %v516_v27 = vsel %vm515_vm15, %v956_v52, %v512_v37 }
 0x156   : > { %v521_v43 = vsel %vm518_vm0, %v520_v42, %v516_v27 }
 0x157   : > { %v501_v35 = vsel %vm500_vm9, %v714_v56, %v497_v31 }
 0x158   : > { %v506_v34 = vsel %vm503_vm11, %v505_v33, %v501_v35 }
 0x15b   : > { %555 = vperm.xlu1 %680, %v506_v34  }
 0x15c   : > { %550 = vperm.xlu2 %681, %v491_v41  }
 0x164   : > { %560 = vperm.xlu2 %681, %v521_v43  }
 0x1a2   : > { %v531_v28 = vpop.permute.xlu2 %530 }
 0x1a3   : > { %v565_v44 = vmul.f32 %v531_v28, %v788_v9  ;;  %v566_v45 = vmul.f32 %v531_v28, %v790_v10 }
 0x1a5   : > { %581 = vst [vmem:[%s988_s7 + $0x10] sm:$0xff] %v565_v44 }
 0x1a6   : > { %582 = vst [vmem:[%s988_s7 + $0x18] sm:$0xff] %v566_v45 }
 0x1ae   : > { %v541_v46 = vpop.permute.xlu2 %540 }
 0x1af   : > { %v569_v47 = vmul.f32 %v541_v46, %v792_v11  ;;  %v570_v48 = vmul.f32 %v541_v46, %v794_v12 }
 0x1b1   : > { %585 = vst [vmem:[%s988_s7 + $0x30] sm:$0xff] %v569_v47 }
 0x1b2   : > { %586 = vst [vmem:[%s988_s7 + $0x38] sm:$0xff] %v570_v48 }
 0x1b6   : > { %v551_v49 = vpop.permute.xlu2 %550 }
 0x1b7   : > { %v573_v51 = vmul.f32 %v551_v49, %v796_v13  ;;  %v574_v9 = vmul.f32 %v551_v49, %v798_v14 }
 0x1b9   : > { %589 = vst [vmem:[%s988_s7 + $0x50] sm:$0xff] %v573_v51  ;;  %v536_v10 = vpop.permute.xlu0 %535 }
 0x1ba   : > { %590 = vst [vmem:[%s988_s7 + $0x58] sm:$0xff] %v574_v9  ;;  %v567_v52 = vmul.f32 %v536_v10, %v774_v2  ;;  %v568_v11 = vmul.f32 %v536_v10, %v778_v4 }
 0x1bb   : > { %v526_v12 = vpop.permute.xlu1 %525 }
 0x1bc   : > { %583 = vst [vmem:[%s988_s7 + $0x20] sm:$0xff] %v567_v52  ;;  %v563_v53 = vmul.f32 %v526_v12, %v770_v0  ;;  %v564_v54 = vmul.f32 %v526_v12, %v772_v1 }
 0x1bd   : > { %584 = vst [vmem:[%s988_s7 + $0x28] sm:$0xff] %v568_v11 }
 0x1be   : > { %579 = vst [vmem:[%s988_s7] sm:$0xff] %v563_v53  ;;  %v561_v13 = vpop.permute.xlu2 %560 }
 0x1bf   : > { %580 = vst [vmem:[%s988_s7 + $0x8] sm:$0xff] %v564_v54  ;;  %v577_v14 = vmul.f32 %v561_v13, %v810_v20  ;;  %v578_v2 = vmul.f32 %v561_v13, %v812_v21 }
 0x1c1   : > { %593 = vst [vmem:[%s988_s7 + $0x70] sm:$0xff] %v577_v14 }
 0x1c2   : > { %594 = vst [vmem:[%s988_s7 + $0x78] sm:$0xff] %v578_v2 }
 0x1c5   : > { %v546_v4 = vpop.permute.xlu1 %545 }
 0x1c6   : > { %v571_v55 = vmul.f32 %v546_v4, %v780_v5  ;;  %v572_v56 = vmul.f32 %v546_v4, %v782_v6 }
 0x1c8   : > { %587 = vst [vmem:[%s988_s7 + $0x40] sm:$0xff] %v571_v55 }
 0x1c9   : > { %588 = vst [vmem:[%s988_s7 + $0x48] sm:$0xff] %v572_v56 }
 0x1cd   : > { %v556_v0 = vpop.permute.xlu1 %555 }
 0x1ce   : > { %v575_v1 = vmul.f32 %v556_v0, %v806_v18  ;;  %v576_v57 = vmul.f32 %v556_v0, %v808_v19 }
 0x1d0   : > { %591 = vst [vmem:[%s988_s7 + $0x60] sm:$0xff] %v575_v1 }
 0x1d1   : > { %592 = vst [vmem:[%s988_s7 + $0x68] sm:$0xff] %v576_v57 }
 0x1d2 PF: > { %s15_s18 = sadd.s32 1, %s721_s18  }
 0x1d3   : > { %p12_p4 = scmp.ge.s32.totalorder %s15_s18, 4  }
 0x1d5   :  { %14 = sbr.rel (!%p12_p4) target bundleno = 1 (0x1), region = 70 }

</bundles_post_ra>
